<compile_context>
chip_gen: v7x
topology: tpu7x:2x2x1
jax: 0.10.0
libtpu: 0.0.40
codegen_flags: <defaults>
</compile_context>

<pallas_src>
import functools

import jax
import jax.numpy as jnp
from jax.experimental import pallas as pl
from jax.experimental.pallas import tpu as pltpu


# Below this many rows the fused XLA path wins (Pallas launch/pipeline setup
# dominates ~2 lane-tiles of work).
_PALLAS_MIN_BATCH = 256
# Default batch-tile cap (multiple of 128).  Large enough that the ~0.35 us
# per-grid-step overhead is a small fraction of per-step HBM time on
# v5e/v6e/v7x, while live VMEM (x/out double-buffers + two [32, bb]
# intermediates) stays under the scoped limit we request below.
_DEFAULT_BLOCK_B = 65536


def mlp_kernel(xt_ref, w1_ref, b1_ref, w2_ref, b2_ref, w3_ref, b3_ref, o_ref,
               *, compute_dtype):
    # xt: [in_dim, Bt]; all intermediates are [features, Bt] (batch in lanes,
    # lane-dense -> unmasked full-lane stores).
    xt = xt_ref[...].astype(compute_dtype)

    h1 = jnp.dot(w1_ref[...].astype(compute_dtype), xt,
                 preferred_element_type=jnp.float32) + b1_ref[...]
    h1 = jnp.maximum(h1, 0.0).astype(compute_dtype)

    h2 = jnp.dot(w2_ref[...].astype(compute_dtype), h1,
                 preferred_element_type=jnp.float32) + b2_ref[...]
    h2 = jnp.maximum(h2, 0.0).astype(compute_dtype)

    out = jnp.dot(w3_ref[...].astype(compute_dtype), h2,
                  preferred_element_type=jnp.float32) + b3_ref[...]
    o_ref[...] = out.astype(o_ref.dtype)


def _pick_block_b(B, block_b):
    """Batch tile: multiple of 128, <= padded batch, and (when possible)
    small enough that the grid has >=2 steps for megacore sharding."""
    padded_b = 128 * pl.cdiv(B, 128)
    bb = min(int(block_b), padded_b)
    if padded_b >= 256:
        bb = min(bb, 128 * pl.cdiv(padded_b // 2, 128))
    bb = max(128, bb - bb % 128)
    return bb


def _mlp_pallas(xt, params, *, block_b, compute_dtype):
    """Feature-major core: xt [in_dim, B] -> [n_out, B]."""
    w1, b1 = params["w1"], params["b1"]
    w2, b2 = params["w2"], params["b2"]
    w3, b3 = params["w3"], params["b3"]

    in_dim, B = xt.shape
    h1_dim, h2_dim, n_out = w1.shape[0], w2.shape[0], w3.shape[0]

    bb = _pick_block_b(B, block_b)
    grid = (pl.cdiv(B, bb),)

    # Rough live-VMEM estimate for the scoped limit (sublane-pad tiny dims);
    # clamp to 48 MiB so it is also valid on v7x's 64 MiB-per-TC VMEM.
    pad8 = lambda d: 8 * pl.cdiv(d, 8)
    cdt_bytes = jnp.dtype(compute_dtype).itemsize
    in_bytes = xt.dtype.itemsize
    est = bb * (2 * pad8(in_dim) * in_bytes      # x double buffer
                + 2 * pad8(n_out) * in_bytes     # out double buffer
                + (h1_dim + h2_dim) * cdt_bytes  # h1 / h2
                + h1_dim * 4)                    # f32 matmul temps
    vmem_limit = int(min(48 << 20, max(32 << 20, 3 * est // 2)))

    # Advisory cost for XLA's scheduler: this call is tiny & memory-bound.
    flops = 2 * B * (in_dim * h1_dim + h1_dim * h2_dim + h2_dim * n_out)
    param_bytes = sum(int(p.size) * p.dtype.itemsize
                      for p in (w1, b1, w2, b2, w3, b3))
    bytes_accessed = (int(xt.size) * in_bytes
                      + B * n_out * in_bytes + param_bytes)

    # Weights/biases are tiny (<10 KB): full-array blocks with constant
    # index_maps keep them resident in VMEM across all grid steps.
    rep = lambda a: pl.BlockSpec(a.shape, lambda i: (0, 0))

    return pl.pallas_call(
        functools.partial(mlp_kernel, compute_dtype=compute_dtype),
        out_shape=jax.ShapeDtypeStruct((n_out, B), xt.dtype),
        grid_spec=pl.GridSpec(
            grid=grid,
            in_specs=[
                pl.BlockSpec((in_dim, bb), lambda i: (0, i)),  # lane-dense x tile
                rep(w1), rep(b1),
                rep(w2), rep(b2),
                rep(w3), rep(b3),
            ],
            out_specs=pl.BlockSpec((n_out, bb), lambda i: (0, i)),
        ),
        compiler_params=pltpu.CompilerParams(
            dimension_semantics=("parallel",),
            vmem_limit_bytes=vmem_limit,
        ),
        cost_estimate=pl.CostEstimate(
            flops=flops, bytes_accessed=bytes_accessed, transcendentals=0),
    )(xt, w1, b1, w2, b2, w3, b3)


def _mlp_xla(x, params):
    """Fused XLA path for tiny batches (Pallas launch overhead dominates)."""
    h = jnp.maximum(x @ params["w1"].T + params["b1"][:, 0], 0.0)
    h = jnp.maximum(h @ params["w2"].T + params["b2"][:, 0], 0.0)
    return h @ params["w3"].T + params["b3"][:, 0]


@functools.partial(jax.jit, static_argnames=("block_b", "compute_dtype"))
def mlp_forward_fm(xt, params, block_b=_DEFAULT_BLOCK_B,
                   compute_dtype=jnp.float32):
    """Preferred feature-major API: xt [input_size, B] -> [n_out, B].

    No transposes anywhere: the batch stays on the 128-lane axis end to end.
    """
    if xt.shape[1] < _PALLAS_MIN_BATCH:
        return _mlp_xla(xt.T, params).T
    return _mlp_pallas(xt, params, block_b=block_b, compute_dtype=compute_dtype)


@functools.partial(jax.jit, static_argnames=("block_b", "compute_dtype"))
def simple_mlp_forward(x, params, block_b=_DEFAULT_BLOCK_B,
                       compute_dtype=jnp.float32):
    """PyTorch SimpleMLP.forward semantics: x [B, input_size] -> [B, n_out].

    The whole path (including the layout transposes) is one jitted program:
    a single dispatch, and the transposes can fuse with neighboring XLA ops
    instead of being standalone HBM read+write passes.
    """
    B = x.shape[0]
    if B < _PALLAS_MIN_BATCH:
        return _mlp_xla(x, params)
    out_t = _mlp_pallas(x.T, params, block_b=block_b,
                        compute_dtype=compute_dtype)
    return out_t.T


def init_params(key, input_size=5, h_dim=(32, 32), n_out=5):
    """Deterministic init mimicking PyTorch nn.Linear defaults
    (uniform(-1/sqrt(fan_in), 1/sqrt(fan_in))), weights stored [out, in]."""
    hs = [input_size] + list(h_dim) + [n_out]
    params = {}
    for idx, (h0, h1) in enumerate(zip(hs, hs[1:]), start=1):
        key, kw, kb = jax.random.split(key, 3)
        bound = 1.0 / jnp.sqrt(jnp.float32(h0))
        params[f"w{idx}"] = jax.random.uniform(
            kw, (h1, h0), jnp.float32, minval=-bound, maxval=bound)
        params[f"b{idx}"] = jax.random.uniform(
            kb, (h1, 1), jnp.float32, minval=-bound, maxval=bound)
    return params


def reference_forward(x, params):
    h = jnp.maximum(x @ params["w1"].T + params["b1"][:, 0], 0.0)
    h = jnp.maximum(h @ params["w2"].T + params["b2"][:, 0], 0.0)
    return h @ params["w3"].T + params["b3"][:, 0]


if __name__ == "__main__":
    key = jax.random.PRNGKey(0)
    key, kx = jax.random.split(key)

    # Small, but large enough to take the Pallas path with two lane-dense
    # grid steps (B=512 -> bb=256 -> grid=(2,)).
    B, input_size, n_out = 512, 5, 5
    x = jax.random.normal(kx, (B, input_size), jnp.float32)
    params = init_params(key, input_size=input_size, h_dim=(32, 32), n_out=n_out)

    ref = reference_forward(x, params)

    # PyTorch-layout wrapper (entire path is one jitted program).
    out = jax.block_until_ready(simple_mlp_forward(x, params))
    assert out.shape == (B, n_out)
    assert jnp.allclose(out, ref, atol=1e-5, rtol=1e-5)

    # Preferred feature-major contract (no transposes anywhere).
    out_fm = jax.block_until_ready(mlp_forward_fm(x.T, params))
    assert out_fm.shape == (n_out, B)
    assert jnp.allclose(out_fm.T, ref, atol=1e-5, rtol=1e-5)

    # Optional bf16 compute path (VMEM/tiling enabler for very large tiles).
    out_bf16 = jax.block_until_ready(
        simple_mlp_forward(x, params, compute_dtype=jnp.bfloat16))
    assert jnp.allclose(out_bf16, ref, atol=1e-1, rtol=5e-2)

    # Tiny-batch XLA fallback keeps identical semantics.
    out_small = jax.block_until_ready(simple_mlp_forward(x[:8], params))
    assert jnp.allclose(out_small, ref[:8], atol=1e-5, rtol=1e-5)

    print("KERNEL_OK")
</pallas_src>

<mosaic_0001>
module attributes {stable_mosaic.version = 11 : i64} {
  func.func @mlp_kernel(%arg0: i32, %arg1: memref<5x256xf32, #tpu.memory_space<vmem>>, %arg2: memref<32x5xf32, #tpu.memory_space<vmem>>, %arg3: memref<32x1xf32, #tpu.memory_space<vmem>>, %arg4: memref<32x32xf32, #tpu.memory_space<vmem>>, %arg5: memref<32x1xf32, #tpu.memory_space<vmem>>, %arg6: memref<5x32xf32, #tpu.memory_space<vmem>>, %arg7: memref<5x1xf32, #tpu.memory_space<vmem>>, %arg8: memref<5x256xf32, #tpu.memory_space<vmem>>) attributes {dimension_semantics = [#tpu.dimension_semantics<parallel>], iteration_bounds = array<i64: 2>, scalar_prefetch = 0 : i64, scratch_operands = 0 : i64, tpu.core_type = #tpu.core_type<tc>, window_params = [{transform_indices = @transform_0, window_bounds = array<i64: 5, 256>}, {pipeline_mode = #tpu.pipeline_mode<synchronous>, transform_indices = @transform_1, window_bounds = array<i64: 32, 5>}, {pipeline_mode = #tpu.pipeline_mode<synchronous>, transform_indices = @transform_2, window_bounds = array<i64: 32, 1>}, {pipeline_mode = #tpu.pipeline_mode<synchronous>, transform_indices = @transform_3, window_bounds = array<i64: 32, 32>}, {pipeline_mode = #tpu.pipeline_mode<synchronous>, transform_indices = @transform_4, window_bounds = array<i64: 32, 1>}, {pipeline_mode = #tpu.pipeline_mode<synchronous>, transform_indices = @transform_5, window_bounds = array<i64: 5, 32>}, {pipeline_mode = #tpu.pipeline_mode<synchronous>, transform_indices = @transform_6, window_bounds = array<i64: 5, 1>}, {transform_indices = @transform_7, window_bounds = array<i64: 5, 256>}]} {
    %c0 = arith.constant 0 : index
    %c0_0 = arith.constant 0 : index
    %0 = vector.load %arg1[%c0, %c0_0] : memref<5x256xf32, #tpu.memory_space<vmem>>, vector<5x256xf32>
    %c0_1 = arith.constant 0 : index
    %c0_2 = arith.constant 0 : index
    %1 = vector.load %arg2[%c0_1, %c0_2] : memref<32x5xf32, #tpu.memory_space<vmem>>, vector<32x5xf32>
    %cst = arith.constant dense<0.000000e+00> : vector<32x256xf32>
    %2 = tpu.matmul %1, %0, %cst {dimension_numbers = #tpu.dot_dimension_numbers<[1], [0], [0], [1], [0, 0, 1, 1], [], []>} : vector<32x5xf32>, vector<5x256xf32>, vector<32x256xf32> -> vector<32x256xf32>
    %c0_3 = arith.constant 0 : index
    %c0_4 = arith.constant 0 : index
    %3 = vector.load %arg3[%c0_3, %c0_4] : memref<32x1xf32, #tpu.memory_space<vmem>>, vector<32x1xf32>
    %4 = vector.broadcast %3 : vector<32x1xf32> to vector<32x256xf32>
    %5 = arith.addf %2, %4 : vector<32x256xf32>
    %cst_5 = arith.constant 0.000000e+00 : f32
    %6 = vector.broadcast %cst_5 : f32 to vector<32x256xf32>
    %7 = arith.maximumf %5, %6 : vector<32x256xf32>
    %c0_6 = arith.constant 0 : index
    %c0_7 = arith.constant 0 : index
    %8 = vector.load %arg4[%c0_6, %c0_7] : memref<32x32xf32, #tpu.memory_space<vmem>>, vector<32x32xf32>
    %cst_8 = arith.constant dense<0.000000e+00> : vector<32x256xf32>
    %9 = tpu.matmul %8, %7, %cst_8 {dimension_numbers = #tpu.dot_dimension_numbers<[1], [0], [0], [1], [0, 0, 1, 1], [], []>} : vector<32x32xf32>, vector<32x256xf32>, vector<32x256xf32> -> vector<32x256xf32>
    %c0_9 = arith.constant 0 : index
    %c0_10 = arith.constant 0 : index
    %10 = vector.load %arg5[%c0_9, %c0_10] : memref<32x1xf32, #tpu.memory_space<vmem>>, vector<32x1xf32>
    %11 = vector.broadcast %10 : vector<32x1xf32> to vector<32x256xf32>
    %12 = arith.addf %9, %11 : vector<32x256xf32>
    %cst_11 = arith.constant 0.000000e+00 : f32
    %13 = vector.broadcast %cst_11 : f32 to vector<32x256xf32>
    %14 = arith.maximumf %12, %13 : vector<32x256xf32>
    %c0_12 = arith.constant 0 : index
    %c0_13 = arith.constant 0 : index
    %15 = vector.load %arg6[%c0_12, %c0_13] : memref<5x32xf32, #tpu.memory_space<vmem>>, vector<5x32xf32>
    %cst_14 = arith.constant dense<0.000000e+00> : vector<5x256xf32>
    %16 = tpu.matmul %15, %14, %cst_14 {dimension_numbers = #tpu.dot_dimension_numbers<[1], [0], [0], [1], [0, 0, 1, 1], [], []>} : vector<5x32xf32>, vector<32x256xf32>, vector<5x256xf32> -> vector<5x256xf32>
    %c0_15 = arith.constant 0 : index
    %c0_16 = arith.constant 0 : index
    %17 = vector.load %arg7[%c0_15, %c0_16] : memref<5x1xf32, #tpu.memory_space<vmem>>, vector<5x1xf32>
    %18 = vector.broadcast %17 : vector<5x1xf32> to vector<5x256xf32>
    %19 = arith.addf %16, %18 : vector<5x256xf32>
    %c0_17 = arith.constant 0 : index
    %c0_18 = arith.constant 0 : index
    %20 = vector.load %arg8[%c0_17, %c0_18] : memref<5x256xf32, #tpu.memory_space<vmem>>, vector<5x256xf32>
    tpu.vector_store %arg8[%c0_17, %c0_18], %19 {strides = array<i32>} : memref<5x256xf32, #tpu.memory_space<vmem>>, vector<5x256xf32>,
    return
  }
  func.func @transform_0(%arg0: i32) -> (i32, i32) {
    %c0_i32 = arith.constant 0 : i32
    %c0_i32_0 = arith.constant 0 : i32
    return %c0_i32, %arg0 : i32, i32
  }
  func.func @transform_1(%arg0: i32) -> (i32, i32) {
    %c0_i32 = arith.constant 0 : i32
    %c0_i32_0 = arith.constant 0 : i32
    %c0_i32_1 = arith.constant 0 : i32
    return %c0_i32, %c0_i32_0 : i32, i32
  }
  func.func @transform_2(%arg0: i32) -> (i32, i32) {
    %c0_i32 = arith.constant 0 : i32
    %c0_i32_0 = arith.constant 0 : i32
    %c0_i32_1 = arith.constant 0 : i32
    return %c0_i32, %c0_i32_0 : i32, i32
  }
  func.func @transform_3(%arg0: i32) -> (i32, i32) {
    %c0_i32 = arith.constant 0 : i32
    %c0_i32_0 = arith.constant 0 : i32
    %c0_i32_1 = arith.constant 0 : i32
    return %c0_i32, %c0_i32_0 : i32, i32
  }
  func.func @transform_4(%arg0: i32) -> (i32, i32) {
    %c0_i32 = arith.constant 0 : i32
    %c0_i32_0 = arith.constant 0 : i32
    %c0_i32_1 = arith.constant 0 : i32
    return %c0_i32, %c0_i32_0 : i32, i32
  }
  func.func @transform_5(%arg0: i32) -> (i32, i32) {
    %c0_i32 = arith.constant 0 : i32
    %c0_i32_0 = arith.constant 0 : i32
    %c0_i32_1 = arith.constant 0 : i32
    return %c0_i32, %c0_i32_0 : i32, i32
  }
  func.func @transform_6(%arg0: i32) -> (i32, i32) {
    %c0_i32 = arith.constant 0 : i32
    %c0_i32_0 = arith.constant 0 : i32
    %c0_i32_1 = arith.constant 0 : i32
    return %c0_i32, %c0_i32_0 : i32, i32
  }
  func.func @transform_7(%arg0: i32) -> (i32, i32) {
    %c0_i32 = arith.constant 0 : i32
    %c0_i32_0 = arith.constant 0 : i32
    return %c0_i32, %arg0 : i32, i32
  }
}

</mosaic_0001>

<bundles_post_ra>
// kernel: simple_mlp_forward.1
= control target key start
LH: loop header
LB: loop body
LE: loop exit
PB: predicated region body
PF: predicated region fallthrough
CT: control target
= control target key end

     0   :  { %12 = vsyncpa [#allocation3], 0  ;;  %s1083_s0 = inlined_call_operand.vmem [shape: f32[5,512], index: 0, kind: input, shape index: {}]   ;;  %s1084_s1 = inlined_call_operand.vmem [shape: f32[32,5], index: 1, kind: input, shape index: {}]   ;;  %s1085_s2 = inlined_call_operand.vmem [shape: f32[32,1], index: 2, kind: input, shape index: {}]   ;;  %s1086_s3 = inlined_call_operand.vmem [shape: f32[32,32], index: 3, kind: input, shape index: {}]   ;;  %s1087_s4 = inlined_call_operand.vmem [shape: f32[32,1], index: 4, kind: input, shape index: {}]   ;;  %s1088_s5 = inlined_call_operand.vmem [shape: f32[5,32], index: 5, kind: input, shape index: {}]   ;;  %s1089_s6 = inlined_call_operand.vmem [shape: f32[5,1], index: 6, kind: input, shape index: {}]   ;;  %s1090_s7 = inlined_call_operand.hbm [shape: f32[5,512], index: 7, kind: output, shape index: {}]  }
   0x1   :  { %14 = vsyncpa [#allocation3 + $0x1], 0  ;;  %s912_s24 = smov 0   ;;  %s914_s25 = smov 0  }
   0x2   :  { %s916_s26 = smov 0   ;;  %s918_s27 = smov 0  }
   0x3 LB: > { %s933_s28 = sadd.s32 4294967295, %s867_s27   ;;  %s722_s29 = sadd.s32 4294967294, %s867_s27   ;;  %s867_s27 = sphi %s918_s27, %s1096_s27   ;;  %s863_s26 = sphi %s916_s26, %s1095_s26   ;;  %s859_s25 = sphi %s914_s25, %s1094_s25   ;;  %s855_s24 = sphi %s912_s24, %s1093_s24  }
   0x4   : > { %s937_s30 = sadd.s32 1, %s867_s27   ;;  %s179_s8 = sadd.s32 1, %s863_s26 }
   0x5   : > { %s176_s9 = ssub.s32 %s867_s27, %s937_s30  ;;  %p189_p0 = scmp.ne.s32.totalorder %s863_s26, %s859_s25 }
   0x6   : > { %p177_p1 = scmp.eq.s32.totalorder %s176_s9, 0  ;;  %p190_p2 = scmp.eq.s32.totalorder %s933_s28, 1 }
   0x7   : > { %p195_p3 = scmp.ne.s32.totalorder %s859_s25, %s855_s24  ;;  %p196_p4 = scmp.eq.s32.totalorder %s722_s29, 1 }
   0x8   : > { %s948_s10 = scalar_select %p177_p1, %s863_s26, %s179_s8  }
   0x9   : > { %p950_p5 = por %p190_p2, %p189_p0  ;;  %p954_p6 = por %p196_p4, %p195_p3 }
   0xa   : > { %p725_p7 = scmp.ge.s32.totalorder %s867_s27, 1  ;;  %p241_p8 = scmp.lt.s32.totalorder %s867_s27, 3 }
   0xc   : > { %p242_p9 = pnand %p725_p7, %p241_p8 }
   0xd   : > { %s727_s13 = sshll.u32 (!%p242_p9), %s933_s28, 1  ;;  %v869_v0 = vmov (!%p242_p9), 0.0   ;;  %v286_v1 = vld [vmem:[%s1085_s2] sm:$0xff] (!%p242_p9)  ;;  %v870_v2 = vmov (!%p242_p9), 0   ;;  %v288_v3 = vld [vmem:[%s1085_s2 + $0x10] sm:$0xff] (!%p242_p9)  ;;  %v287_v4 = vld [vmem:[%s1085_s2 + $0x8] sm:$0xff] (!%p242_p9) }
   0xe   : > { %245 = sbr.rel (%p242_p9) target bundleno = 726 (0x2d6), region = 48  ;;  %p274_p10 = scmp.lt.s32.totalorder (!%p242_p9), %s727_s13, 3  ;;  %394 = vmatprep.mubr.f32.mxu0 (!%p242_p9), %v869_v0  ;;  %532 = vmatprep.mubr.f32.mxu1 (!%p242_p9), %v869_v0  ;;  %v289_v5 = vld [vmem:[%s1085_s2 + $0x18] sm:$0xff] (!%p242_p9)  ;;  %vm323_vm0 = vcmask (!%p242_p9), 1044480   ;;  %v282_v8 = vld [vmem:[%s1084_s1] sm:$0xff] (!%p242_p9)  ;;  %vm310_vm1 = vcmask (!%p242_p9), 39936  }
   0xf   : > { %803 = vset.pattern.permute.xlu0 (!%p242_p9), %v870_v2  ;;  %804 = vset.pattern.permute.xlu1 (!%p242_p9), %v870_v2  ;;  %v431_v9 = vld [vmem:[%s1087_s4] sm:$0xff] (!%p242_p9)  ;;  %v432_v10 = vld [vmem:[%s1087_s4 + $0x8] sm:$0xff] (!%p242_p9)  ;;  %v433_v12 = vld [vmem:[%s1087_s4 + $0x10] sm:$0xff] (!%p242_p9)  ;;  %vm455_vm2 = vcmask (!%p242_p9), 261120   ;;  %s270_s9 = sand.u32 (!%p242_p9), 1, %s859_s25   ;;  %s745_s15 = sshll.u32 (!%p242_p9), %s933_s28, 8 }
  0x10   : > { %292 = vperm.xlu0 (!%p242_p9), %803, %v286_v1   ;;  %302 = vperm.xlu1 (!%p242_p9), %804, %v288_v3   ;;  %v283_v11 = vld [vmem:[%s1084_s1 + $0x8] sm:$0xff] (!%p242_p9)  ;;  %v434_v13 = vld [vmem:[%s1087_s4 + $0x18] sm:$0xff] (!%p242_p9)  ;;  %v284_v14 = vld [vmem:[%s1084_s1 + $0x10] sm:$0xff] (!%p242_p9)  ;;  %s726_s14 = sshll.u32 (!%p242_p9), %s270_s9, 4  ;;  %s1041_s19 = scalar_lea.hbm (!%p242_p9), %s1090_s7, %s745_s15 }
  0x11   : > { %v566_v15 = vld [vmem:[%s1089_s6] sm:$0x1f] (!%p242_p9)  ;;  %v285_v16 = vld [vmem:[%s1084_s1 + $0x18] sm:$0xff] (!%p242_p9)  ;;  %v428_v50 = vld [vmem:[%s1086_s3 + $0x8] sm:$0xff] (!%p242_p9)  ;;  %s272_s16 = scalar_lea.vmem (!%p242_p9), [#allocation2], %s726_s14  ;;  %s649_s28 = scalar_lea.sflag (!%p242_p9), [#allocation3], %s270_s9 }
  0x12   : > { %v427_v49 = vld [vmem:[%s1086_s3] sm:$0xff] (!%p242_p9)  ;;  %v429_v51 = vld [vmem:[%s1086_s3 + $0x10] sm:$0xff] (!%p242_p9)  ;;  %v430_v52 = vld [vmem:[%s1086_s3 + $0x18] sm:$0xff] (!%p242_p9)  ;;  %s871_s21 = smov (!%p242_p9), [#allocation2]  }
  0x14   : > { %297 = vperm.xlu0 (!%p242_p9), %803, %v287_v4   ;;  %307 = vperm.xlu1 (!%p242_p9), %804, %v289_v5  }
  0x15   : > { %s1098_s13 = smov (!%p274_p10, %s727_s13), 3 }
  0x16   : > { %s728_s22 = sshll.u32 %s1098_s13, 3  ;;  %s663_s13 = sshll.u32 %s272_s16, 4  ;;  %s1043_s13 = int_to_ptr.vmem [resolvable:$true] %s663_s13 }
  0x17   : > { %s277_s8 = scalar_lea.vmem %s1083_s0, %s728_s22  ;;  %s805_s20 = scalar_lea.vmem %s1043_s13, 256 }
  0x18   : > { %v281_v6 = vld [vmem:[%s277_s8 + $0x8] sm:$0x1f]  ;;  %v280_v7 = vld [vmem:[%s277_s8] sm:$0x1f]  ;;  %437 = vperm.xlu0 %803, %v431_v9   ;;  %442 = vperm.xlu1 %804, %v432_v10   ;;  %p806_p11 = scmp.ne.s32.totalorder %s1043_s13, %s805_s20  ;;  %s809_s22 = sshll.u32 %s871_s21, 4  ;;  %s810_s22 = int_to_ptr.vmem [resolvable:$false] %s809_s22 }
  0x19   : > { %729 = vmatprep.subr.msk.mxu0 %vm323_vm0, %v281_v6  ;;  %s811_s23 = scalar_lea.vmem %s810_s22, 512  ;;  %p812_p0 = scmp.lt.s32.totalorder %s1043_s13, %s810_s22 }
  0x1a   : > { %730 = vmatpush1.msk.msra.mxu0 %vm323_vm0, %v280_v7  ;;  %p807_p12 = pnand %p806_p11, %p950_p5  ;;  %p813_p1 = scmp.lt.s32.totalorder %s811_s23, %s805_s20 }
  0x1b   : > { %731 = vmatmul.mubr.msk.f32.vlgmr.msra.gmra.mrb[0].mxu0 %vm310_vm1, %v282_v8 }
  0x1c   : > { %400 = vmatprep.mubr.f32.mxu0 %v869_v0  ;;  %447 = vperm.xlu0 %803, %v433_v12   ;;  %p808_p13 = pneg %p807_p12  ;;  %p814_p2 = por %p813_p1, %p812_p0 }
  0x1d   : > { %452 = vperm.xlu1 %804, %v434_v13  }
  0x1e   : > { %p815_p3 = pnand %p814_p2, %p808_p13 }
  0x1f   : > { %732 = vmatmul.mubr.msk.f32.gmra.mrb[2].mxu0 %vm310_vm1, %v283_v11 }
  0x20   : > { %406 = vmatprep.mubr.f32.mxu0 %v869_v0  ;;  %569 = vperm.xlu0 %803, %v566_v15  }
  0x23   : > { %733 = vmatmul.mubr.msk.f32.gmra.mrb[4].mxu0 %vm310_vm1, %v284_v14 }
  0x24   : > { %412 = vmatprep.mubr.f32.mxu0 %v869_v0 }
  0x27   : > { %734 = vmatmul.mubr.msk.f32.gmra.mrb[6].mxu0 %vm310_vm1, %v285_v16 }
  0x28   : > { %639 = vmatprep.mubr.f32.mxu0 %v869_v0 }
  0x8f   : > { %v293_v17 = vpop.permute.xlu0 %292  ;;  %v303_v26 = vpop.permute.xlu1 %302 }
  0x93   : > { %v298_v21 = vpop.permute.xlu0 %297  ;;  %v308_v37 = vpop.permute.xlu1 %307 }
  0x97   : > { %v438_v55 = vpop.permute.xlu0 %437  ;;  %v443_v57 = vpop.permute.xlu1 %442 }
  0x9b   : > { %v448_v6 = vpop.permute.xlu0 %447 }
  0x9c   : > { %v453_v9 = vpop.permute.xlu1 %452 }
  0xee   : > { %v396_v18 = vpop.f32.mrb[0].mxu0 }
  0xef   : > { %v398_v19 = vpop.f32.mrb[1].mxu0  ;;  %v397_v20 = vadd.f32 %v396_v18, %v293_v17 }
  0xf0   : > { %v399_v22 = vadd.f32 %v398_v19, %v293_v17 }
  0xf1   : > { %v419_v28 = vmax.f32 %v397_v20, 0.0 }
  0xf2   : > { %v402_v23 = vpop.f32.mrb[2].mxu0  ;;  %v420_v30 = vmax.f32 %v399_v22, 0.0  ;;  %v570_v22 = vpop.permute.xlu0 %569 }
  0xf3   : > { %v403_v24 = vadd.f32 %v402_v23, %v298_v21  ;;  %v404_v25 = vpop.f32.mrb[3].mxu0 }
  0xf4   : > { %v405_v27 = vadd.f32 %v404_v25, %v298_v21  ;;  %v565_v21 = vld [vmem:[%s1088_s5] sm:$0x1f] }
  0xf5   : > { %v421_v29 = vmax.f32 %v403_v24, 0.0 }
  0xf6   : > { %v422_v31 = vmax.f32 %v405_v27, 0.0  ;;  %v408_v32 = vpop.f32.mrb[4].mxu0 }
  0xf7   : > { %v410_v33 = vpop.f32.mrb[5].mxu0  ;;  %v748_v34 = vpack.c.bf16 %v421_v29, %v419_v28  ;;  %v409_v36 = vadd.f32 %v408_v32, %v303_v26 }
  0xf8   : > { %v746_v35 = vpack.c.bf16 %v422_v31, %v420_v30  ;;  %v411_v38 = vadd.f32 %v410_v33, %v303_v26 }
  0xf9   : > { %v423_v43 = vmax.f32 %v409_v36, 0.0 }
  0xfa   : > { %v414_v39 = vpop.f32.mrb[6].mxu0  ;;  %747 = vmatprep.subr.bf16.mxu1 %v746_v35  ;;  %v424_v45 = vmax.f32 %v411_v38, 0.0 }
  0xfb   : > { %v415_v40 = vadd.f32 %v414_v39, %v308_v37  ;;  %v416_v41 = vpop.f32.mrb[7].mxu0  ;;  %749 = vmatpush1.bf16.msra.mxu1 %v748_v34 }
  0xfc   : > { %v417_v42 = vadd.f32 %v416_v41, %v308_v37 }
  0xfd   : > { %v425_v44 = vmax.f32 %v415_v40, 0.0 }
  0xfe   : > { %v426_v46 = vmax.f32 %v417_v42, 0.0 }
  0xff   : > { %v752_v47 = vpack.c.bf16 %v425_v44, %v423_v43 }
 0x100   : > { %v750_v48 = vpack.c.bf16 %v426_v46, %v424_v45 }
 0x102   : > { %751 = vmatprep.subr.bf16.mxu1 %v750_v48 }
 0x103   : > { %753 = vmatpush1.bf16.msra.mxu1 %v752_v47 }
 0x106   : > { %735 = vmatmul.mubr.msk.f32.vlgmr.msra.gmra.mrb[0].mxu1 %vm455_vm2, %v427_v49 }
 0x107   : > { %538 = vmatprep.mubr.f32.mxu1 %v869_v0 }
 0x10a   : > { %736 = vmatmul.mubr.msk.f32.gmra.mrb[2].mxu1 %vm455_vm2, %v428_v50 }
 0x10b   : > { %544 = vmatprep.mubr.f32.mxu1 %v869_v0 }
 0x10e   : > { %737 = vmatmul.mubr.msk.f32.gmra.mrb[4].mxu1 %vm455_vm2, %v429_v51 }
 0x10f   : > { %550 = vmatprep.mubr.f32.mxu1 %v869_v0 }
 0x112   : > { %738 = vmatmul.mubr.msk.f32.gmra.mrb[6].mxu1 %vm455_vm2, %v430_v52 }
 0x1d9   : > { %v534_v53 = vpop.f32.mrb[0].mxu1 }
 0x1da   : > { %v536_v54 = vpop.f32.mrb[1].mxu1  ;;  %v535_v56 = vadd.f32 %v534_v53, %v438_v55 }
 0x1db   : > { %v537_v58 = vadd.f32 %v536_v54, %v438_v55 }
 0x1dc   : > { %v557_v63 = vmax.f32 %v535_v56, 0.0 }
 0x1dd   : > { %v540_v59 = vpop.f32.mrb[2].mxu1  ;;  %v558_v2 = vmax.f32 %v537_v58, 0.0 }
 0x1de   : > { %v541_v60 = vadd.f32 %v540_v59, %v443_v57  ;;  %v542_v61 = vpop.f32.mrb[3].mxu1 }
 0x1df   : > { %v543_v62 = vadd.f32 %v542_v61, %v443_v57 }
 0x1e0   : > { %v559_v1 = vmax.f32 %v541_v60, 0.0 }
 0x1e1   : > { %v560_v0 = vmax.f32 %v543_v62, 0.0  ;;  %v546_v3 = vpop.f32.mrb[4].mxu1 }
 0x1e2   : > { %v756_v4 = vpack.c.bf16 %v559_v1, %v557_v63  ;;  %v548_v5 = vpop.f32.mrb[5].mxu1  ;;  %v547_v8 = vadd.f32 %v546_v3, %v448_v6 }
 0x1e3   : > { %v754_v7 = vpack.c.bf16 %v560_v0, %v558_v2  ;;  %v549_v10 = vadd.f32 %v548_v5, %v448_v6 }
 0x1e4   : > { %v561_v15 = vmax.f32 %v547_v8, 0.0 }
 0x1e5   : > { %v552_v11 = vpop.f32.mrb[6].mxu1  ;;  %755 = vmatprep.subr.bf16.mxu0 %v754_v7  ;;  %v562_v17 = vmax.f32 %v549_v10, 0.0 }
 0x1e6   : > { %v553_v12 = vadd.f32 %v552_v11, %v453_v9  ;;  %v554_v13 = vpop.f32.mrb[7].mxu1  ;;  %757 = vmatpush1.bf16.msra.mxu0 %v756_v4 }
 0x1e7   : > { %v555_v14 = vadd.f32 %v554_v13, %v453_v9 }
 0x1e8   : > { %v563_v16 = vmax.f32 %v553_v12, 0.0 }
 0x1e9   : > { %v564_v18 = vmax.f32 %v555_v14, 0.0 }
 0x1ea   : > { %v760_v19 = vpack.c.bf16 %v563_v16, %v561_v15 }
 0x1eb   : > { %v758_v20 = vpack.c.bf16 %v564_v18, %v562_v17 }
 0x1ed   : > { %759 = vmatprep.subr.bf16.mxu0 %v758_v20 }
 0x1ee   : > { %761 = vmatpush1.bf16.msra.mxu0 %v760_v19 }
 0x1f1   : > { %739 = vmatmul.mubr.msk.f32.vlgmr.msra.gmra.mrb[8].mxu0 %vm455_vm2, %v565_v21 }
 0x2c4   : > { %v641_v23 = vpop.f32.mrb[8].mxu0 }
 0x2c5   : > { %v642_v24 = vadd.f32 %v641_v23, %v570_v22  ;;  %v643_v25 = vpop.f32.mrb[9].mxu0 }
 0x2c6   : > { %v644_v26 = vadd.f32 %v643_v25, %v570_v22 }
 0x2c7   : > { %646 = vst [vmem:[%s272_s16] sm:$0x1f] %v642_v24 }
 0x2c8   : > { %647 = vst [vmem:[%s272_s16 + $0x8] sm:$0x1f] %v644_v26 }
 0x2c9   : > { %818 = shalt.err (!%p815_p3)
}
 0x2ca   : > { %s819_s29 = scalar_lea.hbm %s1041_s19, 256  ;;  %s823_s14 = scalar_lea.hbm %s1090_s7, 512 }
 0x2cb   : > { %p820_p4 = scmp.ne.s32.totalorder %s1041_s19, %s819_s29  ;;  %p824_p9 = scmp.lt.u32.totalorder %s1041_s19, %s1090_s7 }
 0x2cc   : > { %p825_p10 = scmp.lt.u32.totalorder %s823_s14, %s819_s29  ;;  %p827_p12 = scmp.lt.u32.totalorder %s819_s29, %s1041_s19 }
 0x2cd   : > { %p821_p7 = pnand %p820_p4, %p950_p5 }
 0x2ce   : > { %p826_p11 = por %p825_p10, %p824_p9 }
 0x2cf   : > { %p822_p8 = pneg %p821_p7 }
 0x2d0   : > { %p828_p13 = por %p827_p12, %p826_p11 }
 0x2d2   : > { %p829_p0 = pnand %p828_p13, %p822_p8 }
 0x2d4   : > { %832 = shalt.err (!%p829_p0)
}
 0x2d5   : > { %762 = dma.vmem_to_hbm [thread:$0]  (%p950_p5), %s1043_s13, 256, %s1041_s19, %s649_s28  }
 0x2d6 PF: > { %p768_p1 = scmp.ge.s32.totalorder %s867_s27, 2  ;;  %s675_s17 = sand.u32 1, %s855_s24  }
 0x2d7   : > { %s676_s18 = scalar_lea.sflag [#allocation3], %s675_s17 }
 0x2d8   : > { %p765_p2 = pnand %p768_p1, %p954_p6 }
 0x2da   : > { %850 = dma.done.wait (!%p765_p2), %s676_s18, 256  }
 0x2db   : > { %852 = vsyncadd (!%p765_p2), %s676_s18, 4294967040  ;;  %p17_p3 = scmp.ge.s32.totalorder %s937_s30, 4   ;;  %s1093_s24 = smov %s859_s25 }
 0x2dc   : > { %s1094_s25 = smov %s863_s26  ;;  %s1095_s26 = smov %s948_s10 }
 0x2dd   : > { %s1096_s27 = smov %s937_s30  ;;  %19 = sbr.rel (!%p17_p3) target bundleno = 3 (0x3), region = 83 }
 0x2e4   :  { %681 = vsyncpa [#allocation3], 1 }
 0x2e5   :  { %683 = vsyncpa [#allocation3 + $0x1], 1 }

</bundles_post_ra>
